<compile_context>
chip_gen: v7x
topology: tpu7x:2x2x1
jax: 0.10.0
libtpu: 0.0.40
codegen_flags: <defaults>
</compile_context>

<pallas_src>
import functools

import jax
import jax.numpy as jnp
import numpy as np
from jax.experimental import pallas as pl
from jax.experimental.pallas import tpu as pltpu


# ---------------------------------------------------------------------------
# Kernel: one grid step == TB RNN timesteps for one batch block.
# ---------------------------------------------------------------------------
def _meanfield_block_kernel(inp_ref, x0_ref, diag_ref, sigk_ref, sigo_ref, w_ref,
                            x_out_ref, out_ref, *,
                            rank, n_inp, n_out, S_pad, TB, T, alpha,
                            readout_kappa, tanh_out):
    t_blk = pl.program_id(1)
    F = rank + n_inp
    n_out_eff = 1 if readout_kappa else n_out
    needs_mask = (T % TB) != 0            # static: only the padded tail needs freezing

    # State is carried in the resident x_final output block across time blocks.
    @pl.when(t_blk == 0)
    def _init():
        x_out_ref[...] = x0_ref[...]

    x_blk = x_out_ref[...]                                  # [B_blk, F]
    cols = [x_blk[:, f:f + 1] for f in range(F)]            # state as F columns

    diag = diag_ref[...]                                    # [F_pad, S_pad]
    sigk = sigk_ref[...]                                    # [F_pad, rank*S_pad]
    sigo = sigo_ref[...]                                    # [F_pad, n_out*S_pad]
    w = w_ref[...]                                          # [1, S_pad]

    def contract(lhs_cols, rhs):
        # [B,1] columns x [F_pad, N] -> [B, N]; K-depth <= 8 -> exact-f32 VPU FMAs.
        acc = lhs_cols[0] * rhs[0:1, :]
        for f in range(1, F):
            acc = acc + lhs_cols[f] * rhs[f:f + 1, :]
        return acc

    for k in range(TB):                                     # unrolled at trace time
        t_abs = t_blk * TB + k
        inp = inp_ref[t_abs]                                # [B_blk, n_inp] (VMEM-resident)

        # delta0 / gains from the PRE-update state (matches the torch module).
        delta0 = contract([c * c for c in cols], diag)      # [B, S_pad]
        gains = jax.lax.rsqrt(1.0 + (jnp.pi / 2.0) * delta0)
        gw = gains * w                                      # [B, S_pad]

        # --- state update ---
        ni_all = contract(cols, sigk)                       # [B, rank*S_pad]
        new_cols = []
        for i in range(rank):
            s_i = jnp.sum(ni_all[:, i * S_pad:(i + 1) * S_pad] * gw,
                          axis=1, keepdims=True)
            new_cols.append((1.0 - alpha) * cols[i] + alpha * s_i)
        for j in range(n_inp):
            new_cols.append((1.0 - alpha) * cols[rank + j]
                            + alpha * inp[:, j:j + 1])

        # --- linear readout from the UPDATED state (matches the torch module) ---
        if readout_kappa:
            out_ref[:, k:k + 1] = new_cols[0]
        else:
            wo_all = contract(new_cols, sigo)               # [B, n_out*S_pad]
            coef = gw if tanh_out else w
            for i in range(n_out):
                o = jnp.sum(wo_all[:, i * S_pad:(i + 1) * S_pad] * coef,
                            axis=1, keepdims=True)
                base = k * n_out_eff + i
                out_ref[:, base:base + 1] = o

        # Freeze the state on padded steps past the true sequence length.
        if needs_mask:
            valid = t_abs < T
            cols = [jnp.where(valid, nc, oc) for nc, oc in zip(new_cols, cols)]
        else:
            cols = new_cols

    # One write of the carried state back to the resident final-state block.
    for f in range(F):
        x_out_ref[:, f:f + 1] = cols[f]


# ---------------------------------------------------------------------------
# Constant prep: do this ONCE per model (outside any scan / step loop).
# ---------------------------------------------------------------------------
def prepare_meanfield_coeffs(cov_chols, weights, *, rank, n_inp, n_out):
    cov_chols = jnp.asarray(cov_chols, jnp.float32)
    weights = jnp.asarray(weights, jnp.float32)
    S, L, _ = cov_chols.shape
    F = rank + n_inp
    n_ind, m_ind = n_inp, rank + n_inp
    S_pad = ((S + 127) // 128) * 128       # lane-dense support axis
    F_pad = ((F + 7) // 8) * 8             # sublane-aligned feature axis

    covs = jnp.einsum('sij,skj->sik', cov_chols, cov_chols)   # [S, L, L]

    # column order matches the state layout x = [K | V]
    col_idx = [m_ind + j for j in range(rank)] + list(range(n_inp))

    def pad_fs(mat):                       # [F, S] -> [F_pad, S_pad], zero padded
        return jnp.zeros((F_pad, S_pad), jnp.float32).at[:F, :S].set(mat)

    diag = pad_fs(jnp.stack([covs[:, a, a] for a in col_idx], axis=0))
    sig_dk = jnp.concatenate(
        [pad_fs(jnp.stack([covs[:, n_ind + i, a] for a in col_idx], axis=0))
         for i in range(rank)], axis=1)                        # [F_pad, rank*S_pad]
    sig_out = jnp.concatenate(
        [pad_fs(jnp.stack([covs[:, L - 1 - i, a] for a in col_idx], axis=0))
         for i in range(n_out)], axis=1)                       # [F_pad, n_out*S_pad]
    w_pad = jnp.zeros((1, S_pad), jnp.float32).at[0, :S].set(weights)
    return diag, sig_dk, sig_out, w_pad


# ---------------------------------------------------------------------------
# Fused T-step sequence: one pallas_call, time-blocked, state resident in VMEM.
# ---------------------------------------------------------------------------
def meanfield_rnn_cell_sequence(inputs, x0, coeffs, *, rank, n_inp, n_out, dt, tau,
                                readout_kappa=False, out_nonlinearity='tanh',
                                time_block=16, batch_block=8):
    """inputs: [T, B, n_inp], x0: [B, rank+n_inp]
       returns (x_T: [B, rank+n_inp], outs: [T, B, n_out (or 1)])."""
    diag, sig_dk, sig_out, w_pad = coeffs
    inputs = jnp.asarray(inputs, jnp.float32)
    x0 = jnp.asarray(x0, jnp.float32)
    T, B, _ = inputs.shape
    F = rank + n_inp
    F_pad, S_pad = diag.shape
    n_out_eff = 1 if readout_kappa else n_out

    TB = max(1, min(int(time_block), T))   # timesteps per grid step
    nt = -(-T // TB)
    T_pad = nt * TB
    B_BLK = max(8, ((int(batch_block) + 7) // 8) * 8)
    nb = -(-B // B_BLK)
    B_pad = nb * B_BLK

    inp_p = jnp.zeros((T_pad, B_pad, n_inp), jnp.float32).at[:T, :B].set(inputs)
    x0_p = jnp.zeros((B_pad, F), jnp.float32).at[:B].set(x0)

    kernel = functools.partial(
        _meanfield_block_kernel, rank=rank, n_inp=n_inp, n_out=n_out,
        S_pad=S_pad, TB=TB, T=T, alpha=float(dt) / float(tau),
        readout_kappa=readout_kappa, tanh_out=(out_nonlinearity == 'tanh'))

    x_final, outs = pl.pallas_call(
        kernel,
        out_shape=(jax.ShapeDtypeStruct((B_pad, F), jnp.float32),
                   jax.ShapeDtypeStruct((nt, B_pad, TB * n_out_eff), jnp.float32)),
        grid=(nb, nt),
        in_specs=[
            # full input sequence for a batch block, resident across the time grid
            pl.BlockSpec((T_pad, B_BLK, n_inp), lambda b, t: (0, b, 0)),
            pl.BlockSpec((B_BLK, F), lambda b, t: (b, 0)),                 # x0
            pl.BlockSpec((F_pad, S_pad), lambda b, t: (0, 0)),             # diag
            pl.BlockSpec(tuple(sig_dk.shape), lambda b, t: (0, 0)),        # fused dK slab
            pl.BlockSpec(tuple(sig_out.shape), lambda b, t: (0, 0)),       # fused readout slab
            pl.BlockSpec((1, S_pad), lambda b, t: (0, 0)),                 # weights
        ],
        out_specs=(
            # final state: resident across the time axis (state carrier)
            pl.BlockSpec((B_BLK, F), lambda b, t: (b, 0)),
            # staged, lane-dense per-time-block outputs
            pl.BlockSpec((pl.Squeezed(), B_BLK, TB * n_out_eff),
                         lambda b, t: (t, b, 0)),
        ),
        compiler_params=pltpu.CompilerParams(
            dimension_semantics=("parallel", "arbitrary")),
    )(inp_p, x0_p, diag, sig_dk, sig_out, w_pad)

    # layout plumbing back to [T, B, n_out_eff]
    outs = outs.reshape(nt, B_pad, TB, n_out_eff).transpose(0, 2, 1, 3)
    outs = outs.reshape(T_pad, B_pad, n_out_eff)[:T, :B]
    return x_final[:B], outs


# ---------------------------------------------------------------------------
# Module-exact single-step forward (T = 1 case of the fused kernel).
# ---------------------------------------------------------------------------
def meanfield_rnn_cell_forward(inp, x, cov_chols, weights, *, rank, n_inp, n_out,
                               dt, tau, readout_kappa=False,
                               out_nonlinearity='tanh', coeffs=None):
    if coeffs is None:
        coeffs = prepare_meanfield_coeffs(cov_chols, weights,
                                          rank=rank, n_inp=n_inp, n_out=n_out)
    x_next, outs = meanfield_rnn_cell_sequence(
        inp[None], x, coeffs, rank=rank, n_inp=n_inp, n_out=n_out, dt=dt, tau=tau,
        readout_kappa=readout_kappa, out_nonlinearity=out_nonlinearity)
    return x_next, outs[0]


# ---------------------------------------------------------------------------
# Pure-JAX reference (mirror of the PyTorch forward), for verification.
# ---------------------------------------------------------------------------
def _reference_forward(inp, x, cov_chols, weights, *, rank, n_inp, n_out,
                       dt, tau, readout_kappa=False, out_nonlinearity='tanh'):
    K = x[:, :rank]
    V = x[:, rank:]
    alpha = dt / tau
    covs = jnp.einsum('sij,skj->sik', cov_chols, cov_chols)
    n_ind, m_ind = n_inp, rank + n_inp
    L = covs.shape[1]
    delta0 = sum((K[:, i] ** 2)[:, None] * covs[:, m_ind + i, m_ind + i][None, :]
                 for i in range(rank))
    delta0 = delta0 + sum((V[:, j] ** 2)[:, None] * covs[:, j, j][None, :]
                          for j in range(n_inp))
    gains = 1.0 / jnp.sqrt(1.0 + jnp.pi / 2.0 * delta0)
    dk_cols = []
    for i in range(rank):
        ni = sum(K[:, j][:, None] * covs[:, n_ind + i, m_ind + j][None, :]
                 for j in range(rank))
        ni = ni + sum(V[:, j][:, None] * covs[:, n_ind + i, j][None, :]
                      for j in range(n_inp))
        dk_cols.append(-K[:, i] + jnp.sum(ni * gains * weights[None, :], axis=1))
    dK = jnp.stack(dk_cols, axis=1)
    dV = -V + inp
    K_n = K + alpha * dK
    V_n = V + alpha * dV
    if readout_kappa:
        out = K_n[:, 0:1]
    else:
        cols = []
        for i in range(n_out):
            wo = sum(K_n[:, j][:, None] * covs[:, L - 1 - i, m_ind + j][None, :]
                     for j in range(rank))
            wo = wo + sum(V_n[:, j][:, None] * covs[:, L - 1 - i, j][None, :]
                          for j in range(n_inp))
            coef = (gains * weights[None, :] if out_nonlinearity == 'tanh'
                    else weights[None, :])
            cols.append(jnp.sum(wo * coef, axis=1))
        out = jnp.stack(cols, axis=1)
    return jnp.concatenate([K_n, V_n], axis=1), out


def _reference_sequence(inputs, x0, cov_chols, weights, **kw):
    x = x0
    outs = []
    for t in range(inputs.shape[0]):
        x, o = _reference_forward(inputs[t], x, cov_chols, weights, **kw)
        outs.append(o)
    return x, jnp.stack(outs, axis=0)


if __name__ == "__main__":
    # small, deterministic configuration consistent with the module
    rank, n_inp, n_out, n_supports = 2, 3, 2, 4
    B, T = 4, 8
    dt, tau = 0.1, 0.5
    L = 2 * rank + n_inp + n_out          # loading_dim = 9

    key = jax.random.PRNGKey(0)
    k1, k2, k3 = jax.random.split(key, 3)
    cov_chols = jax.random.normal(k1, (n_supports, L, L), jnp.float32) * 0.3
    weights = jnp.ones((n_supports,), jnp.float32) / n_supports   # non-trainable
    x0 = jax.random.normal(k2, (B, rank + n_inp), jnp.float32)
    inputs = jax.random.normal(k3, (T, B, n_inp), jnp.float32)

    # constant prep, hoisted out of the step loop (once per model)
    coeffs = prepare_meanfield_coeffs(cov_chols, weights,
                                      rank=rank, n_inp=n_inp, n_out=n_out)

    kw = dict(rank=rank, n_inp=n_inp, n_out=n_out, dt=dt, tau=tau,
              readout_kappa=False, out_nonlinearity='tanh')
    TOL = dict(rtol=1e-3, atol=1e-3)

    # 1) module-exact single-step forward
    x1, out1 = meanfield_rnn_cell_forward(inputs[0], x0, cov_chols, weights,
                                          coeffs=coeffs, **kw)
    jax.block_until_ready((x1, out1))
    x1_r, out1_r = _reference_forward(inputs[0], x0, cov_chols, weights, **kw)
    np.testing.assert_allclose(np.asarray(x1), np.asarray(x1_r), **TOL)
    np.testing.assert_allclose(np.asarray(out1), np.asarray(out1_r), **TOL)

    # 2) fused T-step sequence, time-blocked (T divisible by the time block)
    xT, outs = meanfield_rnn_cell_sequence(inputs, x0, coeffs, **kw)
    jax.block_until_ready((xT, outs))
    xT_r, outs_r = _reference_sequence(inputs, x0, cov_chols, weights, **kw)
    np.testing.assert_allclose(np.asarray(xT), np.asarray(xT_r), **TOL)
    np.testing.assert_allclose(np.asarray(outs), np.asarray(outs_r), **TOL)

    # 3) ragged time block (T % TB != 0 exercises the padded-step freeze path)
    xTr, outsr = meanfield_rnn_cell_sequence(inputs, x0, coeffs, time_block=3, **kw)
    jax.block_until_ready((xTr, outsr))
    np.testing.assert_allclose(np.asarray(xTr), np.asarray(xT_r), **TOL)
    np.testing.assert_allclose(np.asarray(outsr), np.asarray(outs_r), **TOL)

    # 4) readout_kappa branch
    kw_k = dict(kw, readout_kappa=True)
    xk, outk = meanfield_rnn_cell_sequence(inputs, x0, coeffs, **kw_k)
    jax.block_until_ready((xk, outk))
    xk_r, outk_r = _reference_sequence(inputs, x0, cov_chols, weights, **kw_k)
    np.testing.assert_allclose(np.asarray(xk), np.asarray(xk_r), **TOL)
    np.testing.assert_allclose(np.asarray(outk), np.asarray(outk_r), **TOL)

    # 5) non-tanh output nonlinearity branch
    kw_i = dict(kw, out_nonlinearity='identity')
    xi, outi = meanfield_rnn_cell_sequence(inputs, x0, coeffs, **kw_i)
    jax.block_until_ready((xi, outi))
    xi_r, outi_r = _reference_sequence(inputs, x0, cov_chols, weights, **kw_i)
    np.testing.assert_allclose(np.asarray(xi), np.asarray(xi_r), **TOL)
    np.testing.assert_allclose(np.asarray(outi), np.asarray(outi_r), **TOL)

    # 6) multi-batch-block path (parallel batch grid axis) with ragged B and T
    B2, T2 = 10, 5
    k4, k5 = jax.random.split(jax.random.PRNGKey(1))
    x0_2 = jax.random.normal(k4, (B2, rank + n_inp), jnp.float32)
    inputs_2 = jax.random.normal(k5, (T2, B2, n_inp), jnp.float32)
    xb, outb = meanfield_rnn_cell_sequence(inputs_2, x0_2, coeffs,
                                           time_block=4, batch_block=8, **kw)
    jax.block_until_ready((xb, outb))
    xb_r, outb_r = _reference_sequence(inputs_2, x0_2, cov_chols, weights, **kw)
    np.testing.assert_allclose(np.asarray(xb), np.asarray(xb_r), **TOL)
    np.testing.assert_allclose(np.asarray(outb), np.asarray(outb_r), **TOL)

    print("KERNEL_OK")
</pallas_src>

<mosaic_0001>
module attributes {stable_mosaic.version = 11 : i64} {
  func.func @_meanfield_block_kernel(%arg0: i32, %arg1: i32, %arg2: memref<1x8x3xf32, #tpu.memory_space<vmem>>, %arg3: memref<8x5xf32, #tpu.memory_space<vmem>>, %arg4: memref<8x128xf32, #tpu.memory_space<vmem>>, %arg5: memref<8x256xf32, #tpu.memory_space<vmem>>, %arg6: memref<8x256xf32, #tpu.memory_space<vmem>>, %arg7: memref<1x128xf32, #tpu.memory_space<vmem>>, %arg8: memref<8x5xf32, #tpu.memory_space<vmem>>, %arg9: memref<1x8x2xf32, #tpu.memory_space<vmem>>) attributes {dimension_semantics = [#tpu.dimension_semantics<parallel>, #tpu.dimension_semantics<arbitrary>], iteration_bounds = array<i64: 1, 1>, scalar_prefetch = 0 : i64, scratch_operands = 0 : i64, tpu.core_type = #tpu.core_type<tc>, window_params = [{transform_indices = @transform_0, window_bounds = array<i64: 1, 8, 3>}, {transform_indices = @transform_1, window_bounds = array<i64: 8, 5>}, {pipeline_mode = #tpu.pipeline_mode<synchronous>, transform_indices = @transform_2, window_bounds = array<i64: 8, 128>}, {pipeline_mode = #tpu.pipeline_mode<synchronous>, transform_indices = @transform_3, window_bounds = array<i64: 8, 256>}, {pipeline_mode = #tpu.pipeline_mode<synchronous>, transform_indices = @transform_4, window_bounds = array<i64: 8, 256>}, {pipeline_mode = #tpu.pipeline_mode<synchronous>, transform_indices = @transform_5, window_bounds = array<i64: 1, 128>}, {transform_indices = @transform_6, window_bounds = array<i64: 8, 5>}, {transform_indices = @transform_7, window_bounds = array<i64: 1, 8, 2>}]} {
    %c0_i32 = arith.constant 0 : i32
    %0 = arith.cmpi eq, %arg1, %c0_i32 : i32
    %1 = arith.extui %0 : i1 to i32
    %c0_i32_0 = arith.constant 0 : i32
    %2 = arith.cmpi ne, %1, %c0_i32_0 : i32
    scf.if %2 {
      %c0_40 = arith.constant 0 : index
      %c0_41 = arith.constant 0 : index
      %157 = vector.load %arg3[%c0_40, %c0_41] : memref<8x5xf32, #tpu.memory_space<vmem>>, vector<8x5xf32>
      %c0_42 = arith.constant 0 : index
      %c0_43 = arith.constant 0 : index
      %158 = vector.load %arg8[%c0_42, %c0_43] : memref<8x5xf32, #tpu.memory_space<vmem>>, vector<8x5xf32>
      tpu.vector_store %arg8[%c0_42, %c0_43], %157 {strides = array<i32>} : memref<8x5xf32, #tpu.memory_space<vmem>>, vector<8x5xf32>,
    } else {
    }
    %c0 = arith.constant 0 : index
    %c0_1 = arith.constant 0 : index
    %3 = vector.load %arg8[%c0, %c0_1] : memref<8x5xf32, #tpu.memory_space<vmem>>, vector<8x5xf32>
    %4 = vector.extract_strided_slice %3 {offsets = [0, 0], sizes = [8, 1], strides = [1, 1]} : vector<8x5xf32> to vector<8x1xf32>
    %5 = vector.extract_strided_slice %3 {offsets = [0, 1], sizes = [8, 1], strides = [1, 1]} : vector<8x5xf32> to vector<8x1xf32>
    %6 = vector.extract_strided_slice %3 {offsets = [0, 2], sizes = [8, 1], strides = [1, 1]} : vector<8x5xf32> to vector<8x1xf32>
    %7 = vector.extract_strided_slice %3 {offsets = [0, 3], sizes = [8, 1], strides = [1, 1]} : vector<8x5xf32> to vector<8x1xf32>
    %8 = vector.extract_strided_slice %3 {offsets = [0, 4], sizes = [8, 1], strides = [1, 1]} : vector<8x5xf32> to vector<8x1xf32>
    %c0_2 = arith.constant 0 : index
    %c0_3 = arith.constant 0 : index
    %9 = vector.load %arg4[%c0_2, %c0_3] : memref<8x128xf32, #tpu.memory_space<vmem>>, vector<8x128xf32>
    %c0_4 = arith.constant 0 : index
    %c0_5 = arith.constant 0 : index
    %10 = vector.load %arg5[%c0_4, %c0_5] : memref<8x256xf32, #tpu.memory_space<vmem>>, vector<8x256xf32>
    %c0_6 = arith.constant 0 : index
    %c0_7 = arith.constant 0 : index
    %11 = vector.load %arg6[%c0_6, %c0_7] : memref<8x256xf32, #tpu.memory_space<vmem>>, vector<8x256xf32>
    %c0_8 = arith.constant 0 : index
    %c0_9 = arith.constant 0 : index
    %12 = vector.load %arg7[%c0_8, %c0_9] : memref<1x128xf32, #tpu.memory_space<vmem>>, vector<1x128xf32>
    %c1_i32 = arith.constant 1 : i32
    %13 = arith.muli %arg1, %c1_i32 : i32
    %c0_i32_10 = arith.constant 0 : i32
    %14 = arith.addi %13, %c0_i32_10 : i32
    %15 = arith.index_cast %14 : i32 to index
    %c0_11 = arith.constant 0 : index
    %c0_12 = arith.constant 0 : index
    %16 = vector.load %arg2[%15, %c0_11, %c0_12] : memref<1x8x3xf32, #tpu.memory_space<vmem>>, vector<1x8x3xf32>
    %17 = vector.shape_cast %16 : vector<1x8x3xf32> to vector<8x3xf32>
    %18 = arith.mulf %4, %4 : vector<8x1xf32>
    %19 = arith.mulf %5, %5 : vector<8x1xf32>
    %20 = arith.mulf %6, %6 : vector<8x1xf32>
    %21 = arith.mulf %7, %7 : vector<8x1xf32>
    %22 = arith.mulf %8, %8 : vector<8x1xf32>
    %23 = vector.extract_strided_slice %9 {offsets = [0, 0], sizes = [1, 128], strides = [1, 1]} : vector<8x128xf32> to vector<1x128xf32>
    %24 = vector.broadcast %18 : vector<8x1xf32> to vector<8x128xf32>
    %25 = vector.broadcast %23 : vector<1x128xf32> to vector<8x128xf32>
    %26 = arith.mulf %24, %25 : vector<8x128xf32>
    %27 = vector.extract_strided_slice %9 {offsets = [1, 0], sizes = [1, 128], strides = [1, 1]} : vector<8x128xf32> to vector<1x128xf32>
    %28 = vector.broadcast %19 : vector<8x1xf32> to vector<8x128xf32>
    %29 = vector.broadcast %27 : vector<1x128xf32> to vector<8x128xf32>
    %30 = arith.mulf %28, %29 : vector<8x128xf32>
    %31 = arith.addf %26, %30 : vector<8x128xf32>
    %32 = vector.extract_strided_slice %9 {offsets = [2, 0], sizes = [1, 128], strides = [1, 1]} : vector<8x128xf32> to vector<1x128xf32>
    %33 = vector.broadcast %20 : vector<8x1xf32> to vector<8x128xf32>
    %34 = vector.broadcast %32 : vector<1x128xf32> to vector<8x128xf32>
    %35 = arith.mulf %33, %34 : vector<8x128xf32>
    %36 = arith.addf %31, %35 : vector<8x128xf32>
    %37 = vector.extract_strided_slice %9 {offsets = [3, 0], sizes = [1, 128], strides = [1, 1]} : vector<8x128xf32> to vector<1x128xf32>
    %38 = vector.broadcast %21 : vector<8x1xf32> to vector<8x128xf32>
    %39 = vector.broadcast %37 : vector<1x128xf32> to vector<8x128xf32>
    %40 = arith.mulf %38, %39 : vector<8x128xf32>
    %41 = arith.addf %36, %40 : vector<8x128xf32>
    %42 = vector.extract_strided_slice %9 {offsets = [4, 0], sizes = [1, 128], strides = [1, 1]} : vector<8x128xf32> to vector<1x128xf32>
    %43 = vector.broadcast %22 : vector<8x1xf32> to vector<8x128xf32>
    %44 = vector.broadcast %42 : vector<1x128xf32> to vector<8x128xf32>
    %45 = arith.mulf %43, %44 : vector<8x128xf32>
    %46 = arith.addf %41, %45 : vector<8x128xf32>
    %cst = arith.constant 1.57079637 : f32
    %47 = vector.broadcast %cst : f32 to vector<8x128xf32>
    %48 = arith.mulf %47, %46 : vector<8x128xf32>
    %cst_13 = arith.constant 1.000000e+00 : f32
    %49 = vector.broadcast %cst_13 : f32 to vector<8x128xf32>
    %50 = arith.addf %49, %48 : vector<8x128xf32>
    %51 = math.rsqrt %50 : vector<8x128xf32>
    %52 = vector.broadcast %12 : vector<1x128xf32> to vector<8x128xf32>
    %53 = arith.mulf %51, %52 : vector<8x128xf32>
    %54 = vector.extract_strided_slice %10 {offsets = [0, 0], sizes = [1, 256], strides = [1, 1]} : vector<8x256xf32> to vector<1x256xf32>
    %55 = vector.broadcast %4 : vector<8x1xf32> to vector<8x256xf32>
    %56 = vector.broadcast %54 : vector<1x256xf32> to vector<8x256xf32>
    %57 = arith.mulf %55, %56 : vector<8x256xf32>
    %58 = vector.extract_strided_slice %10 {offsets = [1, 0], sizes = [1, 256], strides = [1, 1]} : vector<8x256xf32> to vector<1x256xf32>
    %59 = vector.broadcast %5 : vector<8x1xf32> to vector<8x256xf32>
    %60 = vector.broadcast %58 : vector<1x256xf32> to vector<8x256xf32>
    %61 = arith.mulf %59, %60 : vector<8x256xf32>
    %62 = arith.addf %57, %61 : vector<8x256xf32>
    %63 = vector.extract_strided_slice %10 {offsets = [2, 0], sizes = [1, 256], strides = [1, 1]} : vector<8x256xf32> to vector<1x256xf32>
    %64 = vector.broadcast %6 : vector<8x1xf32> to vector<8x256xf32>
    %65 = vector.broadcast %63 : vector<1x256xf32> to vector<8x256xf32>
    %66 = arith.mulf %64, %65 : vector<8x256xf32>
    %67 = arith.addf %62, %66 : vector<8x256xf32>
    %68 = vector.extract_strided_slice %10 {offsets = [3, 0], sizes = [1, 256], strides = [1, 1]} : vector<8x256xf32> to vector<1x256xf32>
    %69 = vector.broadcast %7 : vector<8x1xf32> to vector<8x256xf32>
    %70 = vector.broadcast %68 : vector<1x256xf32> to vector<8x256xf32>
    %71 = arith.mulf %69, %70 : vector<8x256xf32>
    %72 = arith.addf %67, %71 : vector<8x256xf32>
    %73 = vector.extract_strided_slice %10 {offsets = [4, 0], sizes = [1, 256], strides = [1, 1]} : vector<8x256xf32> to vector<1x256xf32>
    %74 = vector.broadcast %8 : vector<8x1xf32> to vector<8x256xf32>
    %75 = vector.broadcast %73 : vector<1x256xf32> to vector<8x256xf32>
    %76 = arith.mulf %74, %75 : vector<8x256xf32>
    %77 = arith.addf %72, %76 : vector<8x256xf32>
    %78 = vector.extract_strided_slice %77 {offsets = [0, 0], sizes = [8, 128], strides = [1, 1]} : vector<8x256xf32> to vector<8x128xf32>
    %79 = arith.mulf %78, %53 : vector<8x128xf32>
    %cst_14 = arith.constant dense<0.000000e+00> : vector<8xf32>
    %80 = vector.multi_reduction <add>, %79, %cst_14 [1] : vector<8x128xf32> to vector<8xf32>
    %81 = vector.shape_cast %80 : vector<8xf32> to vector<8x1xf32>
    %cst_15 = arith.constant 8.000000e-01 : f32
    %82 = vector.broadcast %cst_15 : f32 to vector<8x1xf32>
    %83 = arith.mulf %82, %4 : vector<8x1xf32>
    %cst_16 = arith.constant 2.000000e-01 : f32
    %84 = vector.broadcast %cst_16 : f32 to vector<8x1xf32>
    %85 = arith.mulf %84, %81 : vector<8x1xf32>
    %86 = arith.addf %83, %85 : vector<8x1xf32>
    %87 = vector.extract_strided_slice %77 {offsets = [0, 128], sizes = [8, 128], strides = [1, 1]} : vector<8x256xf32> to vector<8x128xf32>
    %88 = arith.mulf %87, %53 : vector<8x128xf32>
    %cst_17 = arith.constant dense<0.000000e+00> : vector<8xf32>
    %89 = vector.multi_reduction <add>, %88, %cst_17 [1] : vector<8x128xf32> to vector<8xf32>
    %90 = vector.shape_cast %89 : vector<8xf32> to vector<8x1xf32>
    %cst_18 = arith.constant 8.000000e-01 : f32
    %91 = vector.broadcast %cst_18 : f32 to vector<8x1xf32>
    %92 = arith.mulf %91, %5 : vector<8x1xf32>
    %cst_19 = arith.constant 2.000000e-01 : f32
    %93 = vector.broadcast %cst_19 : f32 to vector<8x1xf32>
    %94 = arith.mulf %93, %90 : vector<8x1xf32>
    %95 = arith.addf %92, %94 : vector<8x1xf32>
    %cst_20 = arith.constant 8.000000e-01 : f32
    %96 = vector.broadcast %cst_20 : f32 to vector<8x1xf32>
    %97 = arith.mulf %96, %6 : vector<8x1xf32>
    %98 = vector.extract_strided_slice %17 {offsets = [0, 0], sizes = [8, 1], strides = [1, 1]} : vector<8x3xf32> to vector<8x1xf32>
    %cst_21 = arith.constant 2.000000e-01 : f32
    %99 = vector.broadcast %cst_21 : f32 to vector<8x1xf32>
    %100 = arith.mulf %99, %98 : vector<8x1xf32>
    %101 = arith.addf %97, %100 : vector<8x1xf32>
    %cst_22 = arith.constant 8.000000e-01 : f32
    %102 = vector.broadcast %cst_22 : f32 to vector<8x1xf32>
    %103 = arith.mulf %102, %7 : vector<8x1xf32>
    %104 = vector.extract_strided_slice %17 {offsets = [0, 1], sizes = [8, 1], strides = [1, 1]} : vector<8x3xf32> to vector<8x1xf32>
    %cst_23 = arith.constant 2.000000e-01 : f32
    %105 = vector.broadcast %cst_23 : f32 to vector<8x1xf32>
    %106 = arith.mulf %105, %104 : vector<8x1xf32>
    %107 = arith.addf %103, %106 : vector<8x1xf32>
    %cst_24 = arith.constant 8.000000e-01 : f32
    %108 = vector.broadcast %cst_24 : f32 to vector<8x1xf32>
    %109 = arith.mulf %108, %8 : vector<8x1xf32>
    %110 = vector.extract_strided_slice %17 {offsets = [0, 2], sizes = [8, 1], strides = [1, 1]} : vector<8x3xf32> to vector<8x1xf32>
    %cst_25 = arith.constant 2.000000e-01 : f32
    %111 = vector.broadcast %cst_25 : f32 to vector<8x1xf32>
    %112 = arith.mulf %111, %110 : vector<8x1xf32>
    %113 = arith.addf %109, %112 : vector<8x1xf32>
    %114 = vector.extract_strided_slice %11 {offsets = [0, 0], sizes = [1, 256], strides = [1, 1]} : vector<8x256xf32> to vector<1x256xf32>
    %115 = vector.broadcast %86 : vector<8x1xf32> to vector<8x256xf32>
    %116 = vector.broadcast %114 : vector<1x256xf32> to vector<8x256xf32>
    %117 = arith.mulf %115, %116 : vector<8x256xf32>
    %118 = vector.extract_strided_slice %11 {offsets = [1, 0], sizes = [1, 256], strides = [1, 1]} : vector<8x256xf32> to vector<1x256xf32>
    %119 = vector.broadcast %95 : vector<8x1xf32> to vector<8x256xf32>
    %120 = vector.broadcast %118 : vector<1x256xf32> to vector<8x256xf32>
    %121 = arith.mulf %119, %120 : vector<8x256xf32>
    %122 = arith.addf %117, %121 : vector<8x256xf32>
    %123 = vector.extract_strided_slice %11 {offsets = [2, 0], sizes = [1, 256], strides = [1, 1]} : vector<8x256xf32> to vector<1x256xf32>
    %124 = vector.broadcast %101 : vector<8x1xf32> to vector<8x256xf32>
    %125 = vector.broadcast %123 : vector<1x256xf32> to vector<8x256xf32>
    %126 = arith.mulf %124, %125 : vector<8x256xf32>
    %127 = arith.addf %122, %126 : vector<8x256xf32>
    %128 = vector.extract_strided_slice %11 {offsets = [3, 0], sizes = [1, 256], strides = [1, 1]} : vector<8x256xf32> to vector<1x256xf32>
    %129 = vector.broadcast %107 : vector<8x1xf32> to vector<8x256xf32>
    %130 = vector.broadcast %128 : vector<1x256xf32> to vector<8x256xf32>
    %131 = arith.mulf %129, %130 : vector<8x256xf32>
    %132 = arith.addf %127, %131 : vector<8x256xf32>
    %133 = vector.extract_strided_slice %11 {offsets = [4, 0], sizes = [1, 256], strides = [1, 1]} : vector<8x256xf32> to vector<1x256xf32>
    %134 = vector.broadcast %113 : vector<8x1xf32> to vector<8x256xf32>
    %135 = vector.broadcast %133 : vector<1x256xf32> to vector<8x256xf32>
    %136 = arith.mulf %134, %135 : vector<8x256xf32>
    %137 = arith.addf %132, %136 : vector<8x256xf32>
    %138 = vector.extract_strided_slice %137 {offsets = [0, 0], sizes = [8, 128], strides = [1, 1]} : vector<8x256xf32> to vector<8x128xf32>
    %139 = arith.mulf %138, %53 : vector<8x128xf32>
    %cst_26 = arith.constant dense<0.000000e+00> : vector<8xf32>
    %140 = vector.multi_reduction <add>, %139, %cst_26 [1] : vector<8x128xf32> to vector<8xf32>
    %141 = vector.shape_cast %140 : vector<8xf32> to vector<8x1xf32>
    %c0_27 = arith.constant 0 : index
    %c0_28 = arith.constant 0 : index
    %c0_29 = arith.constant 0 : index
    %142 = vector.load %arg9[%c0_27, %c0_28, %c0_29] : memref<1x8x2xf32, #tpu.memory_space<vmem>>, vector<1x8x1xf32>
    %143 = vector.shape_cast %142 : vector<1x8x1xf32> to vector<8x1xf32>
    %144 = vector.shape_cast %141 : vector<8x1xf32> to vector<1x8x1xf32>
    tpu.vector_store %arg9[%c0_27, %c0_28, %c0_29], %144 {strides = array<i32>} : memref<1x8x2xf32, #tpu.memory_space<vmem>>, vector<1x8x1xf32>,
    %145 = vector.extract_strided_slice %137 {offsets = [0, 128], sizes = [8, 128], strides = [1, 1]} : vector<8x256xf32> to vector<8x128xf32>
    %146 = arith.mulf %145, %53 : vector<8x128xf32>
    %cst_30 = arith.constant dense<0.000000e+00> : vector<8xf32>
    %147 = vector.multi_reduction <add>, %146, %cst_30 [1] : vector<8x128xf32> to vector<8xf32>
    %148 = vector.shape_cast %147 : vector<8xf32> to vector<8x1xf32>
    %c0_31 = arith.constant 0 : index
    %c0_32 = arith.constant 0 : index
    %c1 = arith.constant 1 : index
    %149 = vector.load %arg9[%c0_31, %c0_32, %c1] : memref<1x8x2xf32, #tpu.memory_space<vmem>>, vector<1x8x1xf32>
    %150 = vector.shape_cast %149 : vector<1x8x1xf32> to vector<8x1xf32>
    %151 = vector.shape_cast %148 : vector<8x1xf32> to vector<1x8x1xf32>
    tpu.vector_store %arg9[%c0_31, %c0_32, %c1], %151 {strides = array<i32>} : memref<1x8x2xf32, #tpu.memory_space<vmem>>, vector<1x8x1xf32>,
    %c0_33 = arith.constant 0 : index
    %c0_34 = arith.constant 0 : index
    %152 = vector.load %arg8[%c0_33, %c0_34] : memref<8x5xf32, #tpu.memory_space<vmem>>, vector<8x1xf32>
    tpu.vector_store %arg8[%c0_33, %c0_34], %86 {strides = array<i32>} : memref<8x5xf32, #tpu.memory_space<vmem>>, vector<8x1xf32>,
    %c0_35 = arith.constant 0 : index
    %c1_36 = arith.constant 1 : index
    %153 = vector.load %arg8[%c0_35, %c1_36] : memref<8x5xf32, #tpu.memory_space<vmem>>, vector<8x1xf32>
    tpu.vector_store %arg8[%c0_35, %c1_36], %95 {strides = array<i32>} : memref<8x5xf32, #tpu.memory_space<vmem>>, vector<8x1xf32>,
    %c0_37 = arith.constant 0 : index
    %c2 = arith.constant 2 : index
    %154 = vector.load %arg8[%c0_37, %c2] : memref<8x5xf32, #tpu.memory_space<vmem>>, vector<8x1xf32>
    tpu.vector_store %arg8[%c0_37, %c2], %101 {strides = array<i32>} : memref<8x5xf32, #tpu.memory_space<vmem>>, vector<8x1xf32>,
    %c0_38 = arith.constant 0 : index
    %c3 = arith.constant 3 : index
    %155 = vector.load %arg8[%c0_38, %c3] : memref<8x5xf32, #tpu.memory_space<vmem>>, vector<8x1xf32>
    tpu.vector_store %arg8[%c0_38, %c3], %107 {strides = array<i32>} : memref<8x5xf32, #tpu.memory_space<vmem>>, vector<8x1xf32>,
    %c0_39 = arith.constant 0 : index
    %c4 = arith.constant 4 : index
    %156 = vector.load %arg8[%c0_39, %c4] : memref<8x5xf32, #tpu.memory_space<vmem>>, vector<8x1xf32>
    tpu.vector_store %arg8[%c0_39, %c4], %113 {strides = array<i32>} : memref<8x5xf32, #tpu.memory_space<vmem>>, vector<8x1xf32>,
    return
  }
  func.func @transform_0(%arg0: i32, %arg1: i32) -> (i32, i32, i32) {
    %c0_i32 = arith.constant 0 : i32
    %c0_i32_0 = arith.constant 0 : i32
    %c0_i32_1 = arith.constant 0 : i32
    return %c0_i32, %arg0, %c0_i32_0 : i32, i32, i32
  }
  func.func @transform_1(%arg0: i32, %arg1: i32) -> (i32, i32) {
    %c0_i32 = arith.constant 0 : i32
    %c0_i32_0 = arith.constant 0 : i32
    return %arg0, %c0_i32 : i32, i32
  }
  func.func @transform_2(%arg0: i32, %arg1: i32) -> (i32, i32) {
    %c0_i32 = arith.constant 0 : i32
    %c0_i32_0 = arith.constant 0 : i32
    %c0_i32_1 = arith.constant 0 : i32
    return %c0_i32, %c0_i32_0 : i32, i32
  }
  func.func @transform_3(%arg0: i32, %arg1: i32) -> (i32, i32) {
    %c0_i32 = arith.constant 0 : i32
    %c0_i32_0 = arith.constant 0 : i32
    %c0_i32_1 = arith.constant 0 : i32
    return %c0_i32, %c0_i32_0 : i32, i32
  }
  func.func @transform_4(%arg0: i32, %arg1: i32) -> (i32, i32) {
    %c0_i32 = arith.constant 0 : i32
    %c0_i32_0 = arith.constant 0 : i32
    %c0_i32_1 = arith.constant 0 : i32
    return %c0_i32, %c0_i32_0 : i32, i32
  }
  func.func @transform_5(%arg0: i32, %arg1: i32) -> (i32, i32) {
    %c0_i32 = arith.constant 0 : i32
    %c0_i32_0 = arith.constant 0 : i32
    %c0_i32_1 = arith.constant 0 : i32
    return %c0_i32, %c0_i32_0 : i32, i32
  }
  func.func @transform_6(%arg0: i32, %arg1: i32) -> (i32, i32) {
    %c0_i32 = arith.constant 0 : i32
    %c0_i32_0 = arith.constant 0 : i32
    return %arg0, %c0_i32 : i32, i32
  }
  func.func @transform_7(%arg0: i32, %arg1: i32) -> (i32, i32, i32) {
    %c0_i32 = arith.constant 0 : i32
    %c0_i32_0 = arith.constant 0 : i32
    return %arg1, %arg0, %c0_i32 : i32, i32, i32
  }
}

</mosaic_0001>

<bundles_post_ra>
// kernel: tpu_custom_call.1
= control target key start
LH: loop header
LB: loop body
LE: loop exit
PB: predicated region body
PF: predicated region fallthrough
CT: control target
= control target key end

     0   :  { %13 = vsyncpa [#allocation3], 0  ;;  %s658_s0 = inlined_call_operand.vmem [shape: f32[1,8,3], index: 0, kind: input, shape index: {}]   ;;  %s659_s1 = inlined_call_operand.hbm [shape: f32[8,5], index: 1, kind: input, shape index: {}]   ;;  %s660_s2 = inlined_call_operand.hbm [shape: f32[8,128], index: 2, kind: input, shape index: {}]   ;;  %s661_s3 = inlined_call_operand.vmem [shape: f32[8,256], index: 3, kind: input, shape index: {}]   ;;  %s662_s4 = inlined_call_operand.hbm [shape: f32[8,256], index: 4, kind: input, shape index: {}]   ;;  %s663_s5 = inlined_call_operand.vmem [shape: f32[1,128], index: 5, kind: input, shape index: {}]   ;;  %s664_s6 = inlined_call_operand.hbm [shape: f32[8,5], index: 6, kind: output, shape index: {0}]   ;;  %s665_s7 = inlined_call_operand.vmem [shape: f32[1,8,2], index: 7, kind: output, shape index: {1}]  }
   0x1   :  { %14 = vsyncpa [#allocation6], 0 }
   0x2   :  { %15 = vsyncpa [#allocation4], 0  ;;  %s477_s24 = smov [#allocation5]   ;;  %s478_s26 = smov [#allocation2]  }
   0x3   :  { %s34_s25 = sshll.u32 %s477_s24, 4  ;;  %s24_s27 = sshll.u32 %s478_s26, 4  ;;  %s35_s25 = int_to_ptr.vmem [resolvable:$true] %s34_s25  ;;  %s25_s27 = int_to_ptr.vmem [resolvable:$true] %s24_s27 }
   0x4   :  { %s383_s30 = scalar_lea.hbm %s660_s2, 128 }
   0x5   :  { %p384_p0 = scmp.ne.s32.totalorder %s660_s2, %s383_s30  ;;  %p387_p1 = scmp.lt.u32.totalorder %s383_s30, %s660_s2 }
   0x7   :  { %p389_p2 = pnand %p387_p1, %p384_p0 }
   0x9   :  { %392 = shalt.err (!%p389_p2)
}
   0xa   :  { %s393_s12 = scalar_lea.vmem %s35_s25, 128  ;;  %p398_p4 = scmp.lt.s32.totalorder %s35_s25, %s35_s25 }
   0xb   :  { %p394_p3 = scmp.ne.s32.totalorder %s35_s25, %s393_s12  ;;  %p399_p5 = scmp.lt.s32.totalorder %s393_s12, %s393_s12 }
   0xd   :  { %p400_p6 = por %p399_p5, %p398_p4 }
   0xf   :  { %p401_p7 = pnand %p400_p6, %p394_p3 }
  0x11   :  { %404 = shalt.err (!%p401_p7)
}
  0x12   :  { %37 = dma.hbm_to_vmem [thread:$0]  %s660_s2, 128, %s35_s25, [#allocation6]  }
  0x13   :  { %s405_s17 = scalar_lea.hbm %s659_s1, 128 }
  0x14   :  { %p406_p8 = scmp.ne.s32.totalorder %s659_s1, %s405_s17  ;;  %p409_p9 = scmp.lt.u32.totalorder %s405_s17, %s659_s1 }
  0x16   :  { %p411_p10 = pnand %p409_p9, %p406_p8 }
  0x18   :  { %414 = shalt.err (!%p411_p10)
}
  0x19   :  { %s415_s22 = scalar_lea.vmem %s25_s27, 128  ;;  %p420_p12 = scmp.lt.s32.totalorder %s25_s27, %s25_s27 }
  0x1a   :  { %p416_p11 = scmp.ne.s32.totalorder %s25_s27, %s415_s22  ;;  %p421_p13 = scmp.lt.s32.totalorder %s415_s22, %s415_s22 }
  0x1c   :  { %p422_p0 = por %p421_p13, %p420_p12 }
  0x1e   :  { %p423_p1 = pnand %p422_p0, %p416_p11 }
  0x20   :  { %426 = shalt.err (!%p423_p1)
}
  0x21   :  { %27 = dma.hbm_to_vmem [thread:$0]  %s659_s1, 128, %s25_s27, [#allocation3]  }
  0x22   :  { %s479_s24 = smov [#allocation7]   ;;  %s427_s29 = scalar_lea.hbm %s662_s4, 256 }
  0x23   :  { %s46_s25 = sshll.u32 %s479_s24, 4  ;;  %p428_p2 = scmp.ne.s32.totalorder %s662_s4, %s427_s29  ;;  %s47_s25 = int_to_ptr.vmem [resolvable:$true] %s46_s25 }
  0x24   :  { %p431_p3 = scmp.lt.u32.totalorder %s427_s29, %s662_s4 }
  0x26   :  { %p433_p4 = pnand %p431_p3, %p428_p2 }
  0x28   :  { %436 = shalt.err (!%p433_p4)
}
  0x29   :  { %s437_s11 = scalar_lea.vmem %s47_s25, 256  ;;  %p442_p6 = scmp.lt.s32.totalorder %s47_s25, %s47_s25 }
  0x2a   :  { %p438_p5 = scmp.ne.s32.totalorder %s47_s25, %s437_s11  ;;  %p443_p7 = scmp.lt.s32.totalorder %s437_s11, %s437_s11 }
  0x2c   :  { %p444_p8 = por %p443_p7, %p442_p6 }
  0x2e   :  { %p445_p9 = pnand %p444_p8, %p438_p5 }
  0x30   :  { %448 = shalt.err (!%p445_p9)
}
  0x31   :  { %49 = dma.hbm_to_vmem [thread:$0]  %s662_s4, 256, %s47_s25, [#allocation6]  }
  0x32   :  { %471 = dma.done.wait [#allocation3], 128  }
  0x33   :  { %472 = vsyncadd [#allocation3], 4294967168 }
  0x34   :  { %473 = dma.done.wait [#allocation6], 384  }
  0x35   :  { %474 = vsyncadd [#allocation6], 4294966912  ;;  %v480_v0 = vmov 2   ;;  %v481_v1 = vmov 0   ;;  %vm66_vm0 = vcmask 39936   ;;  %v65_v2 = vld [vmem:[#allocation2] sm:$0xff]  ;;  %v84_v8 = vlaneseq }
  0x36   :  { %367 = vset.pattern.permute.xlu1 %v480_v0  ;;  %365 = vset.pattern.permute.xlu0 %v481_v1  ;;  %67 = vst.msk [vmem:[#allocation8] sm:$0xff] %vm66_vm0, %v65_v2  ;;  %v482_v5 = vmov 3   ;;  %v483_v6 = vmov 1   ;;  %v484_v7 = vmov 4   ;;  %v69_v12 = vld [vmem:[#allocation5] sm:$0xff]  ;;  %v70_v29 = vld [vmem:[%s661_s3] sm:$0xff] }
  0x37   :  { %v85_v9 = vshrl.u32 %v84_v8, 7  ;;  %v71_v30 = vld [vmem:[%s661_s3 + $0x8] sm:$0xff]  ;;  %s485_s18 = smov 2   ;;  %vm319_vm1 = vcmask 7168   ;;  %vm324_vm2 = vcmask 15368   ;;  %vm328_vm3 = vcmask 23568  }
  0x38   :  { %vm330_vm4 = vcmask 31768   ;;  %vm332_vm5 = vcmask 39968  }
  0x39   :  { %v578_v10 = vsub.s32 0, %v85_v9  ;;  %v580_v11 = vsub.s32 1, %v85_v9  ;;  %v582_v14 = vsub.s32 2, %v85_v9  ;;  %v586_v18 = vsub.s32 3, %v85_v9 }
  0x3a   :  { %v588_v19 = vsub.s32 4, %v85_v9 }
  0x3b   :  { %v87_v16 = vrot.slane %v69_v12, %v578_v10  ;;  %v96_v17 = vrot.slane %v69_v12, %v580_v11  ;;  %v106_v20 = vrot.slane %v69_v12, %v582_v14  ;;  %v116_v25 = vrot.slane %v69_v12, %v586_v18 }
  0x3c   :  { %v126_v26 = vrot.slane %v69_v12, %v588_v19  ;;  %v147_v35 = vrot.slane %v70_v29, %v578_v10  ;;  %v151_v36 = vrot.slane %v71_v30, %v578_v10  ;;  %v161_v38 = vrot.slane %v70_v29, %v580_v11  ;;  %v354_v12 = vld [vmem:[%s663_s5] ss:$0 sm:$0xff] }
  0x3d   :  { %v563_v3 = vld [vmem:[#allocation8] sm:$0xff]  ;;  %v165_v39 = vrot.slane %v71_v30, %v580_v11  ;;  %v177_v48 = vrot.slane %v70_v29, %v582_v14  ;;  %v181_v49 = vrot.slane %v71_v30, %v582_v14  ;;  %v193_v53 = vrot.slane %v70_v29, %v586_v18 }
  0x3e   :  { %v78_v4 = vmul.f32 %v563_v3, %v563_v3  ;;  %v197_v54 = vrot.slane %v71_v30, %v586_v18  ;;  %v209_v59 = vrot.slane %v70_v29, %v588_v19  ;;  %v213_v60 = vrot.slane %v71_v30, %v588_v19 }
  0x40   :  { %100 = vperm.xlu1 %367, %v78_v4   ;;  %81 = vperm.xlu0 %365, %v78_v4  }
  0x44   :  { %368 = vset.pattern.permute.xlu1 %v482_v5  ;;  %366 = vset.pattern.permute.xlu0 %v483_v6 }
  0x45   :  { %110 = vperm.xlu1 %368, %v78_v4   ;;  %90 = vperm.xlu0 %366, %v78_v4  }
  0x49   :  { %369 = vset.pattern.permute.xlu1 %v484_v7  ;;  %370 = vset.pattern.permute.xlu0 %v481_v1 }
  0x4a   :  { %120 = vperm.xlu1 %369, %v78_v4   ;;  %141 = vperm.xlu0 %370, %v563_v3  }
  0x4e   :  { %371 = vset.pattern.permute.xlu1 %v483_v6  ;;  %373 = vset.pattern.permute.xlu0 %v482_v5 }
  0x4f   :  { %155 = vperm.xlu1 %371, %v563_v3   ;;  %187 = vperm.xlu0 %373, %v563_v3  }
  0x53   :  { %372 = vset.pattern.permute.xlu1 %v480_v0  ;;  %375 = vset.pattern.permute.xlu0 %v480_v0 }
  0x54   :  { %171 = vperm.xlu1 %372, %v563_v3  }
  0x58   :  { %374 = vset.pattern.permute.xlu1 %v484_v7 }
  0x59   :  { %203 = vperm.xlu1 %374, %v563_v3  }
  0x5d   :  { %376 = vset.pattern.permute.xlu1 %v481_v1 }
  0xbf   :  { %v82_v13 = vpop.permute.xlu0 %81  ;;  %v101_v15 = vpop.permute.xlu1 %100 }
  0xc0   :  { %v88_v23 = vmul.f32 %v87_v16, %v82_v13  ;;  %v107_v27 = vmul.f32 %v106_v20, %v101_v15 }
  0xc4   :  { %v91_v21 = vpop.permute.xlu0 %90  ;;  %v111_v22 = vpop.permute.xlu1 %110 }
  0xc5   :  { %v97_v24 = vmul.f32 %v96_v17, %v91_v21  ;;  %v117_v32 = vmul.f32 %v116_v25, %v111_v22  ;;  %v77_v22 = vld [vmem:[%s658_s0] sm:$0xff]  ;;  %s486_s0 = smov [#allocation8]  }
  0xc6   :  { %s340_s5 = sshll.u32 %s486_s0, 4  ;;  %s341_s5 = int_to_ptr.vmem [resolvable:$true] %s340_s5 }
  0xc7   :  { %v98_v28 = vadd.f32 %v97_v24, %v88_v23  ;;  %v229_v23 = vmul.f32 0.2, %v77_v22  ;;  %v221_v24 = vmul.f32 0.8, %v563_v3  ;;  %v72_v3 = vld [vmem:[#allocation7] sm:$0xff]  ;;  %s449_s19 = scalar_lea.vmem %s341_s5, 128  ;;  %p454_p11 = scmp.lt.s32.totalorder %s341_s5, %s341_s5 }
  0xc8   :  { %p450_p10 = scmp.ne.s32.totalorder %s341_s5, %s449_s19  ;;  %p455_p12 = scmp.lt.s32.totalorder %s449_s19, %s449_s19 }
  0xc9   :  { %v108_v31 = vadd.f32 %v107_v27, %v98_v28  ;;  %v121_v33 = vpop.permute.xlu1 %120  ;;  %v142_v40 = vpop.permute.xlu0 %141 }
  0xca   :  { %v127_v34 = vmul.f32 %v126_v26, %v121_v33  ;;  %v152_v43 = vmul.f32 %v147_v35, %v142_v40  ;;  %v153_v44 = vmul.f32 %v151_v36, %v142_v40  ;;  %v73_v33 = vld [vmem:[#allocation7 + $0x8] sm:$0xff]  ;;  %v243_v35 = vrot.slane %v72_v3, %v578_v10  ;;  %p456_p13 = por %p455_p12, %p454_p11 }
  0xcb   :  { %v118_v37 = vadd.f32 %v117_v32, %v108_v31  ;;  %v247_v36 = vrot.slane %v73_v33, %v578_v10 }
  0xcc   :  { %p457_p0 = pnand %p456_p13, %p450_p10 }
  0xcd   :  { %v128_v41 = vadd.f32 %v127_v34, %v118_v37  ;;  %v258_v37 = vrot.slane %v72_v3, %v580_v11 }
  0xce   :  { %v156_v42 = vpop.permute.xlu1 %155  ;;  %v188_v56 = vpop.permute.xlu0 %187 }
  0xcf   :  { %v129_v45 = vmul.f32 1.5707964, %v128_v41  ;;  %v166_v46 = vmul.f32 %v161_v38, %v156_v42  ;;  %v167_v47 = vmul.f32 %v165_v39, %v156_v42  ;;  %v198_v63 = vmul.f32 %v193_v53, %v188_v56 }
  0xd0   :  { %v199_v0 = vmul.f32 %v197_v54, %v188_v56  ;;  %v275_v38 = vrot.slane %v72_v3, %v582_v14  ;;  %v279_v39 = vrot.slane %v73_v33, %v582_v14 }
  0xd1   :  { %v130_v50 = vadd.f32 1.0, %v129_v45  ;;  %v168_v51 = vadd.f32 %v166_v46, %v152_v43  ;;  %v169_v52 = vadd.f32 %v167_v47, %v153_v44  ;;  %v291_v44 = vrot.slane %v72_v3, %v586_v18 }
  0xd2   :  { %v295_v45 = vrot.slane %v73_v33, %v586_v18 }
  0xd3   :  { %381 = vrsqrt.f32 %v130_v50  ;;  %v172_v55 = vpop.permute.xlu1 %171  ;;  %v311_v50 = vrot.slane %v73_v33, %v588_v19 }
  0xd4   :  { %v182_v57 = vmul.f32 %v177_v48, %v172_v55  ;;  %v183_v58 = vmul.f32 %v181_v49, %v172_v55 }
  0xd6   :  { %v184_v61 = vadd.f32 %v182_v57, %v168_v51  ;;  %v185_v62 = vadd.f32 %v183_v58, %v169_v52 }
  0xd8   :  { %v204_v1 = vpop.permute.xlu1 %203  ;;  %v200_v2 = vadd.f32 %v198_v63, %v184_v61  ;;  %v201_v4 = vadd.f32 %v199_v0, %v185_v62 }
  0xd9   :  { %v214_v8 = vmul.f32 %v209_v59, %v204_v1  ;;  %v215_v9 = vmul.f32 %v213_v60, %v204_v1 }
  0xdb   :  { %v217_v16 = vadd.f32 %v215_v9, %v201_v4  ;;  %v216_v17 = vadd.f32 %v214_v8, %v200_v2 }
  0xdd   :  { %v382_v13 = vpop.eup %381 }
  0xde   :  { %v612_v15 = vmul.f32 %v382_v13, %v354_v12 }
  0xe0   :  { %v224_v20 = vmul.f32 %v217_v16, %v612_v15  ;;  %v218_v21 = vmul.f32 %v216_v17, %v612_v15 }
  0xe2   :  { %225 = vadd.xlane.f32.xlu0 %v224_v20  ;;  %219 = vadd.xlane.f32.xlu1 %v218_v21 }
  0xf8   :  { %231 = vrot.lane.b32.xlu0 %v229_v23, %s485_s18 }
 0x16f   :  { %v226_v25 = vpop.xlane.xlu0 %225  ;;  %v220_v26 = vpop.xlane.xlu1 %219 }
 0x170   :  { %v227_v27 = vmul.f32 0.2, %v226_v25  ;;  %v222_v28 = vmul.f32 0.2, %v220_v26 }
 0x172   :  { %v228_v29 = vadd.f32 %v227_v27, %v221_v24  ;;  %v223_v30 = vadd.f32 %v222_v28, %v221_v24 }
 0x173   :  { %v232_v31 = vpop.permute.xlu0 %231 }
 0x174   :  { %237 = vperm.xlu1 %376, %v223_v30   ;;  %v234_v32 = vadd.f32 %v232_v31, %v221_v24  ;;  %326 = vst.msk [vmem:[#allocation8] sm:$0xff] %vm319_vm1, %v223_v30 }
 0x175   :  { %327 = vst.msk [vmem:[#allocation8] sm:$0xff] %vm324_vm2, %v228_v29 }
 0x176   :  { %269 = vperm.xlu0 %375, %v234_v32   ;;  %329 = vst.msk [vmem:[#allocation8] sm:$0xff] %vm328_vm3, %v234_v32 }
 0x177   :  { %331 = vst.msk [vmem:[#allocation8] sm:$0xff] %vm330_vm4, %v234_v32 }
 0x178   :  { %377 = vset.pattern.permute.xlu1 %v483_v6  ;;  %333 = vst.msk [vmem:[#allocation8] sm:$0xff] %vm332_vm5, %v234_v32  ;;  %v262_v6 = vrot.slane %v73_v33, %v580_v11  ;;  %v307_v11 = vrot.slane %v72_v3, %v588_v19 }
 0x179   :  { %252 = vperm.xlu1 %377, %v228_v29  }
 0x17a   :  { %380 = vset.pattern.permute.xlu0 %v484_v7 }
 0x17d   :  { %378 = vset.pattern.permute.xlu1 %v482_v5 }
 0x17e   :  { %285 = vperm.xlu1 %378, %v234_v32  }
 0x182   :  { %379 = vset.pattern.permute.xlu1 %v484_v7 }
 0x183   :  { %301 = vperm.xlu1 %379, %v234_v32  }
 0x1f3   :  { %v238_v34 = vpop.permute.xlu1 %237 }
 0x1f4   :  { %v248_v41 = vmul.f32 %v243_v35, %v238_v34  ;;  %v249_v7 = vmul.f32 %v247_v36, %v238_v34 }
 0x1f5   :  { %v270_v40 = vpop.permute.xlu0 %269 }
 0x1f6   :  { %v280_v47 = vmul.f32 %v275_v38, %v270_v40  ;;  %v281_v48 = vmul.f32 %v279_v39, %v270_v40 }
 0x1f8   :  { %v253_v5 = vpop.permute.xlu1 %252 }
 0x1f9   :  { %v263_v42 = vmul.f32 %v258_v37, %v253_v5  ;;  %v264_v43 = vmul.f32 %v262_v6, %v253_v5 }
 0x1fb   :  { %v265_v46 = vadd.f32 %v263_v42, %v248_v41  ;;  %v266_v10 = vadd.f32 %v264_v43, %v249_v7 }
 0x1fd   :  { %v286_v49 = vpop.permute.xlu1 %285  ;;  %v282_v14 = vadd.f32 %v280_v47, %v265_v46  ;;  %v283_v51 = vadd.f32 %v281_v48, %v266_v10 }
 0x1fe   :  { %v296_v52 = vmul.f32 %v291_v44, %v286_v49  ;;  %v297_v53 = vmul.f32 %v295_v45, %v286_v49 }
 0x200   :  { %v298_v55 = vadd.f32 %v296_v52, %v282_v14  ;;  %v299_v56 = vadd.f32 %v297_v53, %v283_v51 }
 0x202   :  { %v302_v54 = vpop.permute.xlu1 %301 }
 0x203   :  { %v312_v57 = vmul.f32 %v307_v11, %v302_v54  ;;  %v313_v58 = vmul.f32 %v311_v50, %v302_v54 }
 0x205   :  { %v315_v59 = vadd.f32 %v313_v58, %v299_v56  ;;  %v314_v18 = vadd.f32 %v312_v57, %v298_v55 }
 0x207   :  { %v321_v60 = vmul.f32 %v315_v59, %v612_v15  ;;  %v316_v61 = vmul.f32 %v314_v18, %v612_v15 }
 0x209   :  { %322 = vadd.xlane.f32.xlu1 %v321_v60  ;;  %317 = vadd.xlane.f32.xlu0 %v316_v61 }
 0x20a   :  { %460 = shalt.err (!%p457_p0)
}
 0x20b   :  { %s461_s22 = scalar_lea.hbm %s664_s6, 128 }
 0x20c   :  { %p462_p1 = scmp.ne.s32.totalorder %s664_s6, %s461_s22  ;;  %p465_p2 = scmp.lt.u32.totalorder %s461_s22, %s664_s6 }
 0x20e   :  { %p467_p3 = pnand %p465_p2, %p462_p1 }
 0x210   :  { %470 = shalt.err (!%p467_p3)
}
 0x211   :  { %343 = dma.vmem_to_hbm [thread:$0]  %s341_s5, 128, %s664_s6, [#allocation4]  }
 0x296   :  { %v323_v19 = vpop.xlane.xlu1 %322  ;;  %v318_v62 = vpop.xlane.xlu0 %317 }
 0x297   :  { %320 = vst.msk [vmem:[%s665_s7] sm:$0xff] %vm319_vm1, %v318_v62 }
 0x298   :  { %325 = vst.msk [vmem:[%s665_s7] sm:$0xff] %vm324_vm2, %v323_v19 }
 0x299   :  { %475 = dma.done.wait [#allocation4], 128  }
 0x29a   :  { %476 = vsyncadd [#allocation4], 4294967168 }
 0x29b   :  { %351 = vsyncpa [#allocation3], 1 }
 0x29c   :  { %352 = vsyncpa [#allocation6], 1 }
 0x29d   :  { %353 = vsyncpa [#allocation4], 1 }

</bundles_post_ra>
